<compile_context>
chip_gen: v5e
topology: v5e:2x2
jax: 0.10.0
libtpu: 0.0.40
codegen_flags: <defaults>
</compile_context>

<pallas_src>
import jax
import jax.numpy as jnp
from jax.experimental import pallas as pl
from jax.experimental.pallas import tpu as pltpu

# ----------------------------- model dims (small) ---------------------------
OBS_DIM = 32
H0, H1 = 64, 32
ACTIONS = 8
HEAD_OUT = ACTIONS + 1          # fused [mu | value]
OBS_CLIP = 5.0
EPS = 1e-5
TB_MAX = 1024                   # max batch tile (lanes per grid step, mult of 128)

# columns inside the packed (VEC_ROWS, VEC_COLS) "vecs" slab (column vectors)
VEC_ROWS, VEC_COLS = 64, 8
_COL_SCALE, _COL_SHIFT, _COL_B0, _COL_B1, _COL_BH = 0, 1, 2, 3, 4


def _elu(x):
    # ELU(alpha=1): x if x > 0 else exp(x) - 1.  exp goes to the EUP slot;
    # min(x, 0) keeps the unselected branch finite.
    return jnp.where(x > 0.0, x, jnp.exp(jnp.minimum(x, 0.0)) - 1.0)


def _a2c_kernel(obs_ref, vecs_ref, w0t_ref, w1t_ref, wht_ref, out_ref):
    # packed column vectors: one small resident load, static slices afterwards
    vecs = vecs_ref[...]
    scale = vecs[0:OBS_DIM, _COL_SCALE:_COL_SCALE + 1]   # (OBS_DIM, 1)
    shift = vecs[0:OBS_DIM, _COL_SHIFT:_COL_SHIFT + 1]   # (OBS_DIM, 1)
    b0 = vecs[0:H0, _COL_B0:_COL_B0 + 1]                 # (H0, 1)
    b1 = vecs[0:H1, _COL_B1:_COL_B1 + 1]                 # (H1, 1)
    bh = vecs[0:HEAD_OUT, _COL_BH:_COL_BH + 1]           # (HEAD_OUT, 1)

    # [TB, OBS_DIM] -> [OBS_DIM, TB]: put batch on the lane axis.  The XLU
    # transpose uses a separate issue slot; everything below is lane-dense.
    x = obs_ref[...].astype(jnp.float32).T

    # --- obs normalization (pre-folded RunningMeanStd) ---
    x = jnp.clip(x * scale + shift, -OBS_CLIP, OBS_CLIP)

    # --- MLP trunk: Linear + ELU, Linear + ELU (weights pre-transposed) ---
    h0 = _elu(jnp.dot(w0t_ref[...], x, preferred_element_type=jnp.float32) + b0)
    h1 = _elu(jnp.dot(w1t_ref[...], h0, preferred_element_type=jnp.float32) + b1)

    # --- fused heads: [mu | value] in one MXU pass, lane-dense store ---
    out = jnp.dot(wht_ref[...], h1, preferred_element_type=jnp.float32) + bh
    out_ref[...] = out.astype(out_ref.dtype)


def prepare_params(params):
    """Host-side (once per stats/weight update) param folding & packing."""
    scale = jax.lax.rsqrt(params["running_var"] + EPS)          # (1, OBS_DIM)
    shift = -params["running_mean"] * scale                     # (1, OBS_DIM)
    w_head = jnp.concatenate([params["w_mu"], params["w_v"]], axis=1)  # (H1, 9)
    b_head = jnp.concatenate([params["b_mu"], params["b_v"]], axis=1)  # (1, 9)

    vecs = jnp.zeros((VEC_ROWS, VEC_COLS), jnp.float32)
    vecs = vecs.at[:OBS_DIM, _COL_SCALE].set(scale[0])
    vecs = vecs.at[:OBS_DIM, _COL_SHIFT].set(shift[0])
    vecs = vecs.at[:H0, _COL_B0].set(params["b0"][0])
    vecs = vecs.at[:H1, _COL_B1].set(params["b1"][0])
    vecs = vecs.at[:HEAD_OUT, _COL_BH].set(b_head[0])

    return {
        "vecs": vecs,
        "w0_t": params["w0"].T,          # (H0, OBS_DIM)
        "w1_t": params["w1"].T,          # (H1, H0)
        "wh_t": w_head.T,                # (HEAD_OUT, H1)
        "sigma": params["sigma"],
    }


def _choose_tb(batch, tb_max=TB_MAX):
    """Batch tile: multiple of 128 (lane axis), <= tb_max, and small enough
    that the grid has >= 2 steps when possible (keeps both v7x TCs busy)."""
    half = -(-batch // 2)                       # cdiv(batch, 2)
    half_up = ((half + 127) // 128) * 128       # round up to lane multiple
    return max(128, min(tb_max, half_up))


def model_wrapper_forward(obs, prepared, *, tb_max=TB_MAX):
    """obs: [B, OBS_DIM] (f32 or bf16) -> (mu [B,A], sigma [B,A], value [B,1])."""
    B = obs.shape[0]
    tb = _choose_tb(B, tb_max)
    num_tiles = pl.cdiv(B, tb)

    itemsize = jnp.dtype(obs.dtype).itemsize
    flops = 2 * B * (OBS_DIM * H0 + H0 * H1 + H1 * HEAD_OUT)
    transcendentals = B * (H0 + H1)
    bytes_accessed = (
        B * OBS_DIM * itemsize + B * HEAD_OUT * 4
        + 4 * (VEC_ROWS * VEC_COLS + OBS_DIM * H0 + H0 * H1 + H1 * HEAD_OUT)
    )

    # Output is [HEAD_OUT, B] (batch on lanes); sliced/transposed below.
    out_t = pl.pallas_call(
        _a2c_kernel,
        out_shape=jax.ShapeDtypeStruct((HEAD_OUT, B), jnp.float32),
        grid=(num_tiles,),
        in_specs=[
            pl.BlockSpec((tb, OBS_DIM), lambda i: (i, 0)),        # obs tile
            pl.BlockSpec((VEC_ROWS, VEC_COLS), lambda i: (0, 0)), # packed vecs
            pl.BlockSpec((H0, OBS_DIM), lambda i: (0, 0)),        # w0^T (resident)
            pl.BlockSpec((H1, H0), lambda i: (0, 0)),             # w1^T (resident)
            pl.BlockSpec((HEAD_OUT, H1), lambda i: (0, 0)),       # fused head^T
        ],
        out_specs=pl.BlockSpec((HEAD_OUT, tb), lambda i: (0, i)),
        compiler_params=pltpu.CompilerParams(
            dimension_semantics=("parallel",)),
        cost_estimate=pl.CostEstimate(
            flops=flops,
            transcendentals=transcendentals,
            bytes_accessed=bytes_accessed),
        # If xprof shows exposed obs DMA at step boundaries, add
        # pipeline_mode=pl.Buffered(3) to the obs BlockSpec only.
    )(obs, prepared["vecs"], prepared["w0_t"], prepared["w1_t"], prepared["wh_t"])

    mu = out_t[:ACTIONS, :].T
    value = out_t[ACTIONS:, :].T
    # sigma is obs-independent -> pure XLA broadcast outside the kernel.
    # TODO(synk): rl_games usually treats this as a log-std (exp() before
    # building the Gaussian); the wrapper exports the raw network output,
    # matching ModelWrapper / a2c_network semantics.
    sigma = jnp.broadcast_to(prepared["sigma"], mu.shape)
    return mu, sigma, value


def make_params(key):
    """Deterministic synthetic parameters matching the module's shapes."""
    keys = jax.random.split(key, 8)

    def lin(k, fan_in, fan_out):
        scale = 1.0 / jnp.sqrt(jnp.float32(fan_in))
        return jax.random.uniform(k, (fan_in, fan_out), jnp.float32, -scale, scale)

    return {
        "running_mean": jax.random.normal(keys[0], (1, OBS_DIM), jnp.float32) * 0.1,
        "running_var": jnp.abs(jax.random.normal(keys[1], (1, OBS_DIM), jnp.float32)) + 1.0,
        "w0": lin(keys[2], OBS_DIM, H0),
        "b0": jnp.zeros((1, H0), jnp.float32),
        "w1": lin(keys[3], H0, H1),
        "b1": jnp.zeros((1, H1), jnp.float32),
        "w_mu": lin(keys[4], H1, ACTIONS),
        "b_mu": jnp.zeros((1, ACTIONS), jnp.float32),
        "w_v": lin(keys[5], H1, 1),
        "b_v": jnp.zeros((1, 1), jnp.float32),
        "sigma": jnp.zeros((1, ACTIONS), jnp.float32),
    }


def _reference_forward(obs, p):
    x = (obs - p["running_mean"]) * jax.lax.rsqrt(p["running_var"] + EPS)
    x = jnp.clip(x, -OBS_CLIP, OBS_CLIP)
    h0 = _elu(x @ p["w0"] + p["b0"])
    h1 = _elu(h0 @ p["w1"] + p["b1"])
    mu = h1 @ p["w_mu"] + p["b_mu"]
    val = h1 @ p["w_v"] + p["b_v"]
    sigma = jnp.zeros_like(mu) + p["sigma"]
    return mu, sigma, val


if __name__ == "__main__":
    key = jax.random.PRNGKey(0)
    k_obs, k_obs2, k_params = jax.random.split(key, 3)

    params = make_params(k_params)
    prepared = prepare_params(params)

    # batched case: tb=128 -> grid=(2,), both TensorCores on v7x
    obs = jax.random.normal(k_obs, (256, OBS_DIM), jnp.float32)
    mu, sigma, value = model_wrapper_forward(obs, prepared)
    jax.block_until_ready((mu, sigma, value))

    mu_r, sigma_r, value_r = _reference_forward(obs, params)
    assert jnp.allclose(mu, mu_r, atol=1e-4), "mu mismatch (batched)"
    assert jnp.allclose(sigma, sigma_r, atol=1e-4), "sigma mismatch (batched)"
    assert jnp.allclose(value, value_r, atol=1e-4), "value mismatch (batched)"

    # tiny-batch case exercises the partial-final-tile path (no host-side pad)
    obs2 = jax.random.normal(k_obs2, (2, OBS_DIM), jnp.float32)
    mu2, sigma2, value2 = model_wrapper_forward(obs2, prepared)
    jax.block_until_ready((mu2, sigma2, value2))

    mu2_r, sigma2_r, value2_r = _reference_forward(obs2, params)
    assert jnp.allclose(mu2, mu2_r, atol=1e-4), "mu mismatch (tiny batch)"
    assert jnp.allclose(sigma2, sigma2_r, atol=1e-4), "sigma mismatch (tiny batch)"
    assert jnp.allclose(value2, value2_r, atol=1e-4), "value mismatch (tiny batch)"

    # bf16-stored obs (halved input DMA); math stays f32 inside the kernel.
    obs_bf = obs.astype(jnp.bfloat16)
    mu_b, sigma_b, value_b = model_wrapper_forward(obs_bf, prepared)
    jax.block_until_ready((mu_b, sigma_b, value_b))

    mu_br, sigma_br, value_br = _reference_forward(obs_bf.astype(jnp.float32), params)
    assert jnp.allclose(mu_b, mu_br, atol=1e-4), "mu mismatch (bf16 obs)"
    assert jnp.allclose(sigma_b, sigma_br, atol=1e-4), "sigma mismatch (bf16 obs)"
    assert jnp.allclose(value_b, value_br, atol=1e-4), "value mismatch (bf16 obs)"

    print("KERNEL_OK")
</pallas_src>

<mosaic_0001>
module attributes {stable_mosaic.version = 11 : i64} {
  func.func @_a2c_kernel(%arg0: i32, %arg1: memref<128x32xf32, #tpu.memory_space<vmem>>, %arg2: memref<64x8xf32, #tpu.memory_space<vmem>>, %arg3: memref<64x32xf32, #tpu.memory_space<vmem>>, %arg4: memref<32x64xf32, #tpu.memory_space<vmem>>, %arg5: memref<9x32xf32, #tpu.memory_space<vmem>>, %arg6: memref<9x128xf32, #tpu.memory_space<vmem>>) attributes {dimension_semantics = [#tpu.dimension_semantics<parallel>], iteration_bounds = array<i64: 2>, scalar_prefetch = 0 : i64, scratch_operands = 0 : i64, tpu.core_type = #tpu.core_type<tc>, window_params = [{transform_indices = @transform_0, window_bounds = array<i64: 128, 32>}, {pipeline_mode = #tpu.pipeline_mode<synchronous>, transform_indices = @transform_1, window_bounds = array<i64: 64, 8>}, {pipeline_mode = #tpu.pipeline_mode<synchronous>, transform_indices = @transform_2, window_bounds = array<i64: 64, 32>}, {pipeline_mode = #tpu.pipeline_mode<synchronous>, transform_indices = @transform_3, window_bounds = array<i64: 32, 64>}, {pipeline_mode = #tpu.pipeline_mode<synchronous>, transform_indices = @transform_4, window_bounds = array<i64: 9, 32>}, {transform_indices = @transform_5, window_bounds = array<i64: 9, 128>}]} {
    %c0 = arith.constant 0 : index
    %c0_0 = arith.constant 0 : index
    %0 = vector.load %arg2[%c0, %c0_0] : memref<64x8xf32, #tpu.memory_space<vmem>>, vector<64x8xf32>
    %1 = vector.extract_strided_slice %0 {offsets = [0, 0], sizes = [32, 1], strides = [1, 1]} : vector<64x8xf32> to vector<32x1xf32>
    %2 = vector.extract_strided_slice %0 {offsets = [0, 1], sizes = [32, 1], strides = [1, 1]} : vector<64x8xf32> to vector<32x1xf32>
    %3 = vector.extract_strided_slice %0 {offsets = [0, 2], sizes = [64, 1], strides = [1, 1]} : vector<64x8xf32> to vector<64x1xf32>
    %4 = vector.extract_strided_slice %0 {offsets = [0, 3], sizes = [32, 1], strides = [1, 1]} : vector<64x8xf32> to vector<32x1xf32>
    %5 = vector.extract_strided_slice %0 {offsets = [0, 4], sizes = [9, 1], strides = [1, 1]} : vector<64x8xf32> to vector<9x1xf32>
    %c0_1 = arith.constant 0 : index
    %c0_2 = arith.constant 0 : index
    %6 = vector.load %arg1[%c0_1, %c0_2] : memref<128x32xf32, #tpu.memory_space<vmem>>, vector<128x32xf32>
    %7 = tpu.transpose %6, [1, 0] : vector<128x32xf32> -> vector<32x128xf32>
    %8 = vector.broadcast %1 : vector<32x1xf32> to vector<32x128xf32>
    %9 = arith.mulf %7, %8 : vector<32x128xf32>
    %10 = vector.broadcast %2 : vector<32x1xf32> to vector<32x128xf32>
    %11 = arith.addf %9, %10 : vector<32x128xf32>
    %cst = arith.constant -5.000000e+00 : f32
    %cst_3 = arith.constant 5.000000e+00 : f32
    %12 = vector.broadcast %cst : f32 to vector<32x128xf32>
    %13 = arith.maximumf %12, %11 : vector<32x128xf32>
    %14 = vector.broadcast %cst_3 : f32 to vector<32x128xf32>
    %15 = arith.minimumf %14, %13 : vector<32x128xf32>
    %c0_4 = arith.constant 0 : index
    %c0_5 = arith.constant 0 : index
    %16 = vector.load %arg3[%c0_4, %c0_5] : memref<64x32xf32, #tpu.memory_space<vmem>>, vector<64x32xf32>
    %cst_6 = arith.constant dense<0.000000e+00> : vector<64x128xf32>
    %17 = tpu.matmul %16, %15, %cst_6 {dimension_numbers = #tpu.dot_dimension_numbers<[1], [0], [0], [1], [0, 0, 1, 1], [], []>} : vector<64x32xf32>, vector<32x128xf32>, vector<64x128xf32> -> vector<64x128xf32>
    %18 = vector.broadcast %3 : vector<64x1xf32> to vector<64x128xf32>
    %19 = arith.addf %17, %18 : vector<64x128xf32>
    %cst_7 = arith.constant 0.000000e+00 : f32
    %20 = vector.broadcast %cst_7 : f32 to vector<64x128xf32>
    %21 = arith.cmpf ogt, %19, %20 : vector<64x128xf32>
    %cst_8 = arith.constant 0.000000e+00 : f32
    %22 = vector.broadcast %cst_8 : f32 to vector<64x128xf32>
    %23 = arith.minimumf %19, %22 : vector<64x128xf32>
    %24 = math.exp %23 : vector<64x128xf32>
    %cst_9 = arith.constant 1.000000e+00 : f32
    %25 = vector.broadcast %cst_9 : f32 to vector<64x128xf32>
    %26 = arith.subf %24, %25 : vector<64x128xf32>
    %27 = arith.select %21, %19, %26 : vector<64x128xi1>, vector<64x128xf32>
    %c0_10 = arith.constant 0 : index
    %c0_11 = arith.constant 0 : index
    %28 = vector.load %arg4[%c0_10, %c0_11] : memref<32x64xf32, #tpu.memory_space<vmem>>, vector<32x64xf32>
    %cst_12 = arith.constant dense<0.000000e+00> : vector<32x128xf32>
    %29 = tpu.matmul %28, %27, %cst_12 {dimension_numbers = #tpu.dot_dimension_numbers<[1], [0], [0], [1], [0, 0, 1, 1], [], []>} : vector<32x64xf32>, vector<64x128xf32>, vector<32x128xf32> -> vector<32x128xf32>
    %30 = vector.broadcast %4 : vector<32x1xf32> to vector<32x128xf32>
    %31 = arith.addf %29, %30 : vector<32x128xf32>
    %cst_13 = arith.constant 0.000000e+00 : f32
    %32 = vector.broadcast %cst_13 : f32 to vector<32x128xf32>
    %33 = arith.cmpf ogt, %31, %32 : vector<32x128xf32>
    %cst_14 = arith.constant 0.000000e+00 : f32
    %34 = vector.broadcast %cst_14 : f32 to vector<32x128xf32>
    %35 = arith.minimumf %31, %34 : vector<32x128xf32>
    %36 = math.exp %35 : vector<32x128xf32>
    %cst_15 = arith.constant 1.000000e+00 : f32
    %37 = vector.broadcast %cst_15 : f32 to vector<32x128xf32>
    %38 = arith.subf %36, %37 : vector<32x128xf32>
    %39 = arith.select %33, %31, %38 : vector<32x128xi1>, vector<32x128xf32>
    %c0_16 = arith.constant 0 : index
    %c0_17 = arith.constant 0 : index
    %40 = vector.load %arg5[%c0_16, %c0_17] : memref<9x32xf32, #tpu.memory_space<vmem>>, vector<9x32xf32>
    %cst_18 = arith.constant dense<0.000000e+00> : vector<9x128xf32>
    %41 = tpu.matmul %40, %39, %cst_18 {dimension_numbers = #tpu.dot_dimension_numbers<[1], [0], [0], [1], [0, 0, 1, 1], [], []>} : vector<9x32xf32>, vector<32x128xf32>, vector<9x128xf32> -> vector<9x128xf32>
    %42 = vector.broadcast %5 : vector<9x1xf32> to vector<9x128xf32>
    %43 = arith.addf %41, %42 : vector<9x128xf32>
    %c0_19 = arith.constant 0 : index
    %c0_20 = arith.constant 0 : index
    %44 = vector.load %arg6[%c0_19, %c0_20] : memref<9x128xf32, #tpu.memory_space<vmem>>, vector<9x128xf32>
    tpu.vector_store %arg6[%c0_19, %c0_20], %43 {strides = array<i32>} : memref<9x128xf32, #tpu.memory_space<vmem>>, vector<9x128xf32>,
    return
  }
  func.func @transform_0(%arg0: i32) -> (i32, i32) {
    %c0_i32 = arith.constant 0 : i32
    %c0_i32_0 = arith.constant 0 : i32
    return %arg0, %c0_i32 : i32, i32
  }
  func.func @transform_1(%arg0: i32) -> (i32, i32) {
    %c0_i32 = arith.constant 0 : i32
    %c0_i32_0 = arith.constant 0 : i32
    %c0_i32_1 = arith.constant 0 : i32
    return %c0_i32, %c0_i32_0 : i32, i32
  }
  func.func @transform_2(%arg0: i32) -> (i32, i32) {
    %c0_i32 = arith.constant 0 : i32
    %c0_i32_0 = arith.constant 0 : i32
    %c0_i32_1 = arith.constant 0 : i32
    return %c0_i32, %c0_i32_0 : i32, i32
  }
  func.func @transform_3(%arg0: i32) -> (i32, i32) {
    %c0_i32 = arith.constant 0 : i32
    %c0_i32_0 = arith.constant 0 : i32
    %c0_i32_1 = arith.constant 0 : i32
    return %c0_i32, %c0_i32_0 : i32, i32
  }
  func.func @transform_4(%arg0: i32) -> (i32, i32) {
    %c0_i32 = arith.constant 0 : i32
    %c0_i32_0 = arith.constant 0 : i32
    %c0_i32_1 = arith.constant 0 : i32
    return %c0_i32, %c0_i32_0 : i32, i32
  }
  func.func @transform_5(%arg0: i32) -> (i32, i32) {
    %c0_i32 = arith.constant 0 : i32
    %c0_i32_0 = arith.constant 0 : i32
    return %c0_i32, %arg0 : i32, i32
  }
}

</mosaic_0001>

<bundles_post_ra>
// kernel: tpu_custom_call.1
= control target key start
LH: loop header
LB: loop body
LE: loop exit
PB: predicated region body
PF: predicated region fallthrough
CT: control target
= control target key end

     0   :  { %10 = vsyncpa [#allocation3], 0  ;;  %s1163_s0 = inlined_call_operand.vmem [shape: f32[256,32], index: 0, kind: input, shape index: {}]   ;;  %s1164_s1 = inlined_call_operand.vmem [shape: f32[64,8], index: 1, kind: input, shape index: {}]   ;;  %s1165_s2 = inlined_call_operand.vmem [shape: f32[64,32], index: 2, kind: input, shape index: {}]   ;;  %s1166_s3 = inlined_call_operand.vmem [shape: f32[32,64], index: 3, kind: input, shape index: {}]   ;;  %s1167_s4 = inlined_call_operand.vmem [shape: f32[9,32], index: 4, kind: input, shape index: {}]   ;;  %s1168_s5 = inlined_call_operand.hbm [shape: f32[9,256], index: 5, kind: output, shape index: {}]  }
   0x1   :  { %12 = vsyncpa [#allocation3 + $0x1], 0  ;;  %s934_s18 = smov 0   ;;  %s936_s19 = smov 0  }
   0x2   :  { %s938_s20 = smov 0   ;;  %s940_s21 = smov 0  }
   0x3 LB: > { %s955_s22 = sadd.s32 4294967295, %s894_s21   ;;  %s695_s23 = sadd.s32 4294967294, %s894_s21   ;;  %s894_s21 = sphi %s940_s21, %s1174_s21   ;;  %s890_s20 = sphi %s938_s20, %s1173_s20   ;;  %s886_s19 = sphi %s936_s19, %s1172_s19   ;;  %s882_s18 = sphi %s934_s18, %s1171_s18  }
   0x4   : > { %s959_s24 = sadd.s32 1, %s894_s21   ;;  %s135_s25 = sadd.s32 1, %s890_s20 }
   0x5   : > { %s132_s26 = ssub.s32 %s894_s21, %s959_s24  ;;  %p145_p0 = scmp.ne.s32.totalorder %s890_s20, %s886_s19 }
   0x6   : > { %p133_p1 = scmp.eq.s32.totalorder %s132_s26, 0  ;;  %p146_p2 = scmp.eq.s32.totalorder %s955_s22, 1 }
   0x7   : > { %p151_p3 = scmp.ne.s32.totalorder %s886_s19, %s882_s18  ;;  %p152_p4 = scmp.eq.s32.totalorder %s695_s23, 1 }
   0x8   : > { %s970_s27 = scalar_select %p133_p1, %s890_s20, %s135_s25  }
   0x9   : > { %p972_p5 = por %p146_p2, %p145_p0  ;;  %p976_p6 = por %p152_p4, %p151_p3 }
   0xa   : > { %p698_p7 = scmp.ge.s32.totalorder %s894_s21, 1  ;;  %p191_p8 = scmp.lt.s32.totalorder %s894_s21, 3 }
   0xc   : > { %p192_p9 = pnand %p698_p7, %p191_p8 }
   0xd   : > { %s700_s9 = sshll.u32 (!%p192_p9), %s955_s22, 4  ;;  %s216_s6 = sand.u32 (!%p192_p9), 1, %s886_s19  }
   0xe   : > { %195 = sbr.rel (%p192_p9) target bundleno = 756 (0x2f4), region = 40  ;;  %p220_p10 = scmp.lt.s32.totalorder (!%p192_p9), %s700_s9, 31 }
   0xf   : > { %s699_s7 = sshll.u32 (!%p192_p9), %s216_s6, 4  ;;  %s733_s8 = sshll.u32 (!%p192_p9), %s955_s22, 3 }
  0x10   : > { %s629_s11 = scalar_lea.hbm (!%p192_p9), %s1168_s5, %s733_s8  ;;  %s619_s15 = scalar_lea.sflag (!%p192_p9), [#allocation3], %s216_s6 }
  0x11   : > { %s632_s14 = sshll.u32 (!%p192_p9), %s629_s11, 4  ;;  %s852_s25 = scalar_lea.hbm (!%p192_p9), %s1168_s5, 32  ;;  %s633_s14 = int_to_ptr.hbm [resolvable:$true] %s632_s14 }
  0x12   : > { %s846_s16 = sshra.s32 (!%p192_p9), %s633_s14, 4  ;;  %s847_s16 = int_to_ptr.hbm [resolvable:$true] %s846_s16 }
  0x13   : > { %v985_v0 = vld [vmem:[%s1164_s1 + $0x10] sm:$0xff]  ;;  %v896_v1 = vmov 1   ;;  %v897_v2 = vmov 0   ;;  %v991_v3 = vld [vmem:[%s1164_s1] sm:$0xff]  ;;  %v998_v4 = vld [vmem:[%s1164_s1 + $0x18] sm:$0xff]  ;;  %s1176_s9 = smov (!%p220_p10, %s700_s9), 31  ;;  %p853_p0 = scmp.lt.s32.totalorder %s847_s16, %s1168_s5 }
  0x14   : > { %798 = vset.pattern.permute.xlu2 %v896_v1  ;;  %796 = vset.pattern.permute.xlu1 %v896_v1  ;;  %s701_s12 = sshll.u32 %s1176_s9, 3  ;;  %v1005_v5 = vld [vmem:[%s1164_s1 + $0x8] sm:$0xff]  ;;  %v898_v23 = vmov 2   ;;  %v232_v24 = vld [vmem:[%s1164_s1 + $0x38] sm:$0xff]  ;;  %v229_v27 = vld [vmem:[%s1164_s1 + $0x20] sm:$0xff]  ;;  %vm377_vm0 = vcmask 261120  }
  0x15   : > { %314 = vperm.xlu2 %798, %v985_v0   ;;  %795 = vset.pattern.permute.xlu0 %v897_v2  ;;  %s1011_s17 = scalar_lea.vmem %s1163_s0, %s701_s12  ;;  %v230_v26 = vld [vmem:[%s1164_s1 + $0x28] sm:$0xff]  ;;  %v231_v30 = vld [vmem:[%s1164_s1 + $0x30] sm:$0xff]  ;;  %v333_v51 = vld [vmem:[%s1165_s2] sm:$0xff]  ;;  %vm511_vm9 = vcmask 523264   ;;  %s218_s12 = scalar_lea.vmem [#allocation2], %s699_s7 }
  0x16   : > { %318 = vperm.xlu1 %796, %v998_v4   ;;  %298 = vperm.xlu0 %795, %v998_v4   ;;  %v233_v6 = vld [vmem:[%s1011_s17] sm:$0xff]  ;;  %v234_v7 = vld [vmem:[%s1011_s17 + $0x8] sm:$0xff]  ;;  %v235_v8 = vld [vmem:[%s1011_s17 + $0x10] sm:$0xff]  ;;  %s630_s13 = sshll.u32 %s218_s12, 4  ;;  %s848_s22 = scalar_lea.hbm %s847_s16, 16  ;;  %s631_s13 = int_to_ptr.vmem [resolvable:$true] %s630_s13 }
  0x17   : > { %v236_v9 = vld [vmem:[%s1011_s17 + $0x18] sm:$0xff]  ;;  %v237_v10 = vld [vmem:[%s1011_s17 + $0x20] sm:$0xff]  ;;  %v238_v11 = vld [vmem:[%s1011_s17 + $0x28] sm:$0xff]  ;;  %p849_p11 = scmp.ne.s32.totalorder %s847_s16, %s848_s22  ;;  %p854_p1 = scmp.lt.s32.totalorder %s852_s25, %s848_s22 }
  0x18   : > { %v239_v12 = vld [vmem:[%s1011_s17 + $0x30] sm:$0xff]  ;;  %v240_v13 = vld [vmem:[%s1011_s17 + $0x38] sm:$0xff]  ;;  %v241_v14 = vld [vmem:[%s1011_s17 + $0x40] sm:$0xff] }
  0x19   : > { %v242_v15 = vld [vmem:[%s1011_s17 + $0x48] sm:$0xff]  ;;  %v243_v16 = vld [vmem:[%s1011_s17 + $0x50] sm:$0xff]  ;;  %v244_v17 = vld [vmem:[%s1011_s17 + $0x58] sm:$0xff]  ;;  %p850_p12 = pnand %p849_p11, %p972_p5  ;;  %p855_p2 = por %p854_p1, %p853_p0 }
  0x1a   : > { %v245_v18 = vld [vmem:[%s1011_s17 + $0x60] sm:$0xff]  ;;  %v246_v19 = vld [vmem:[%s1011_s17 + $0x68] sm:$0xff]  ;;  %v247_v20 = vld [vmem:[%s1011_s17 + $0x70] sm:$0xff] }
  0x1b   : > { %v248_v21 = vld [vmem:[%s1011_s17 + $0x78] sm:$0xff]  ;;  %v337_v52 = vld [vmem:[%s1165_s2 + $0x20] sm:$0xff]  ;;  %v334_v53 = vld [vmem:[%s1165_s2 + $0x8] sm:$0xff]  ;;  %p851_p13 = pneg %p850_p12 }
  0x1c   : > { %v338_v54 = vld [vmem:[%s1165_s2 + $0x28] sm:$0xff]  ;;  %v335_v55 = vld [vmem:[%s1165_s2 + $0x10] sm:$0xff]  ;;  %v336_v57 = vld [vmem:[%s1165_s2 + $0x18] sm:$0xff] }
  0x1d   : > { %799 = vset.pattern.permute.xlu2 %v897_v2  ;;  %v339_v56 = vld [vmem:[%s1165_s2 + $0x30] sm:$0xff]  ;;  %v340_v58 = vld [vmem:[%s1165_s2 + $0x38] sm:$0xff]  ;;  %p856_p3 = pnand %p855_p2, %p851_p13 }
  0x1e   : > { %283 = vperm.xlu2 %799, %v991_v3   ;;  %797 = vset.pattern.permute.xlu1 %v897_v2 }
  0x1f   : > { %293 = vperm.xlu0 %795, %v985_v0   ;;  %288 = vperm.xlu1 %797, %v1005_v5  }
  0x27   : > { %800 = vset.pattern.permute.xlu0 %v896_v1  ;;  %801 = vset.pattern.permute.xlu1 %v896_v1 }
  0x28   : > { %310 = vperm.xlu0 %800, %v1005_v5   ;;  %306 = vperm.xlu1 %801, %v991_v3  }
  0x30   : > { %802 = vset.pattern.permute.xlu1 %v898_v23  ;;  %803 = vset.pattern.permute.xlu0 %v898_v23 }
  0x31   : > { %374 = vperm.xlu1 %802, %v232_v24   ;;  %369 = vperm.xlu0 %803, %v231_v30  }
  0x39   : > { %364 = vperm.xlu1 %802, %v230_v26   ;;  %354 = vperm.xlu0 %803, %v998_v4  }
  0x41   : > { %359 = vperm.xlu1 %802, %v229_v27   ;;  %346 = vperm.xlu0 %803, %v1005_v5  }
  0x44   : > { %249 = vxpose.xlu2.b32.start [1/16] (narrow) %v233_v6, 32 }
  0x49   : > { %350 = vperm.xlu1 %802, %v985_v0  }
  0x4c   : > { %250 = vxpose.xlu2.b32.cont [2/16] (narrow) %v234_v7, 32 }
  0x51   : > { %342 = vperm.xlu1 %802, %v991_v3  }
  0x54   : > { %251 = vxpose.xlu2.b32.cont [3/16] (narrow) %v235_v8, 32 }
  0x5c   : > { %252 = vxpose.xlu2.b32.cont [4/16] (narrow) %v236_v9, 32 }
  0x64   : > { %253 = vxpose.xlu2.b32.cont [5/16] (narrow) %v237_v10, 32 }
  0x6c   : > { %254 = vxpose.xlu2.b32.cont [6/16] (narrow) %v238_v11, 32 }
  0x6f   : > { %v315_v22 = vpop.permute.xlu2 %314 }
  0x74   : > { %255 = vxpose.xlu2.b32.cont [7/16] (narrow) %v239_v12, 32 }
  0x78   : > { %v284_v25 = vpop.permute.xlu2 %283 }
  0x7c   : > { %256 = vxpose.xlu2.b32.cont [8/16] (narrow) %v240_v13, 32 }
  0x84   : > { %257 = vxpose.xlu2.b32.cont [9/16] (narrow) %v241_v14, 32 }
  0x88   : > { %v299_v29 = vpop.permute.xlu0 %298  ;;  %v319_v31 = vpop.permute.xlu1 %318 }
  0x8c   : > { %258 = vxpose.xlu2.b32.cont [10/16] (narrow) %v242_v15, 32 }
  0x91   : > { %v294_v33 = vpop.permute.xlu0 %293  ;;  %v289_v35 = vpop.permute.xlu1 %288 }
  0x94   : > { %259 = vxpose.xlu2.b32.cont [11/16] (narrow) %v243_v16, 32 }
  0x9a   : > { %v311_v40 = vpop.permute.xlu0 %310  ;;  %v307_v44 = vpop.permute.xlu1 %306 }
  0x9c   : > { %260 = vxpose.xlu2.b32.cont [12/16] (narrow) %v244_v17, 32 }
  0xa3   : > { %v375_v59 = vpop.permute.xlu1 %374  ;;  %v370_v1 = vpop.permute.xlu0 %369 }
  0xa4   : > { %261 = vxpose.xlu2.b32.cont [13/16] (narrow) %v245_v18, 32 }
  0xab   : > { %v365_v61 = vpop.permute.xlu1 %364  ;;  %v355_v8 = vpop.permute.xlu0 %354 }
  0xac   : > { %262 = vxpose.xlu2.b32.cont [14/16] (narrow) %v246_v19, 32 }
  0xb3   : > { %v360_v2 = vpop.permute.xlu1 %359  ;;  %v347_v18 = vpop.permute.xlu0 %346 }
  0xb4   : > { %263 = vxpose.xlu2.b32.cont [15/16] (narrow) %v247_v20, 32 }
  0xbb   : > { %v351_v9 = vpop.permute.xlu1 %350 }
  0xbc   : > { %264 = vxpose.xlu2.b32.end [16/16] (narrow) %v248_v21, 32 }
  0xc3   : > { %v343_v20 = vpop.permute.xlu1 %342 }
  0xdd   : > { %v265_v28 = vpop.trf.xlu2 }
  0xde   : > { %v301_v41 = vmul.f32 %v284_v25, %v265_v28  ;;  %v899_v25 = vmov 3  }
  0xdf   : > { %804 = vset.pattern.permute.xlu0 %v899_v25  ;;  %805 = vset.pattern.permute.xlu1 %v899_v25 }
  0xe0   : > { %v321_v47 = vadd.f32 %v307_v44, %v301_v41  ;;  %508 = vperm.xlu0 %804, %v998_v4   ;;  %504 = vperm.xlu1 %805, %v985_v0  }
  0xe2   : > { %v702_v50 = vclamps-f32 %v321_v47, 5.0 }
  0xe5   : > { %v266_v32 = vpop.trf.xlu2 }
  0xe6   : > { %v302_v38 = vmul.f32 %v289_v35, %v266_v32 }
  0xe8   : > { %v322_v45 = vadd.f32 %v311_v40, %v302_v38  ;;  %496 = vperm.xlu0 %804, %v991_v3   ;;  %500 = vperm.xlu1 %805, %v1005_v5  }
  0xea   : > { %v703_v49 = vclamps-f32 %v322_v45, 5.0 }
  0xed   : > { %v267_v34 = vpop.trf.xlu2 }
  0xee   : > { %v303_v36 = vmul.f32 %v294_v33, %v267_v34 }
  0xf0   : > { %v323_v43 = vadd.f32 %v315_v22, %v303_v36 }
  0xf2   : > { %v704_v48 = vclamps-f32 %v323_v43, 5.0 }
  0xf5   : > { %v268_v37 = vpop.trf.xlu2 }
  0xf6   : > { %v304_v39 = vmul.f32 %v299_v29, %v268_v37 }
  0xf8   : > { %v324_v42 = vadd.f32 %v319_v31, %v304_v39 }
  0xfa   : > { %v705_v46 = vclamps-f32 %v324_v42, 5.0 }
  0xfc   : > { %414 = vmatpush.msra.mxu0 %v705_v46  ;;  %736 = vmatpush.msra.mxu3 %v705_v46 }
  0xfe   : > { %415 = vmatpush.msra.mxu0 %v704_v48  ;;  %737 = vmatpush.msra.mxu3 %v704_v48 }
 0x100   : > { %416 = vmatpush.msra.mxu0 %v703_v49  ;;  %738 = vmatpush.msra.mxu3 %v703_v49 }
 0x102   : > { %417 = vmatpush.msra.mxu0 %v702_v50  ;;  %739 = vmatpush.msra.mxu3 %v702_v50 }
 0x103   : > { %706 = vmatmul.msk.f32.vlgmr.msra.gmra.mxu0 %vm377_vm0, %v333_v51  ;;  %710 = vmatmul.msk.f32.vlgmr.msra.gmra.mxu3 %vm377_vm0, %v337_v52 }
 0x10b   : > { %707 = vmatmul.msk.f32.gmra.mxu0 %vm377_vm0, %v334_v53  ;;  %711 = vmatmul.msk.f32.gmra.mxu3 %vm377_vm0, %v338_v54 }
 0x113   : > { %708 = vmatmul.msk.f32.gmra.mxu0 %vm377_vm0, %v335_v55  ;;  %712 = vmatmul.msk.f32.gmra.mxu3 %vm377_vm0, %v339_v56 }
 0x11b   : > { %709 = vmatmul.msk.f32.gmra.mxu0 %vm377_vm0, %v336_v57  ;;  %713 = vmatmul.msk.f32.gmra.mxu3 %vm377_vm0, %v340_v58 }
 0x180   : > { %v419_v60 = vpop.f32.mrf.mxu0 }
 0x181   : > { %v1092_v30 = vadd.f32 %v419_v60, %v343_v20  ;;  %v900_v20 = vmov 4  }
 0x182   : > { %806 = vset.pattern.permute.xlu1 %v900_v20  ;;  %807 = vset.pattern.permute.xlu0 %v900_v20 }
 0x183   : > { %v451_v4 = vmin.f32 %v1092_v30, 0.0  ;;  %vm443_vm8 = vcmp.gt.f32.partialorder %v1092_v30, 0.0  ;;  %580 = vperm.xlu1 %806, %v991_v3   ;;  %584 = vperm.xlu0 %807, %v1005_v5  }
 0x185   : > { %v459_v40 = vmul.f32 1.442695, %v451_v4  ;;  %v577_v4 = vld [vmem:[%s1167_s4] sm:$0xff] }
 0x186   : > { %v431_v62 = vpop.f32.mrf.mxu3 }
 0x187   : > { %v1080_v14 = vadd.f32 %v431_v62, %v360_v2  ;;  %v494_v62 = vld [vmem:[%s1166_s3 + $0x18] sm:$0xff]  ;;  %v493_v2 = vld [vmem:[%s1166_s3 + $0x10] sm:$0xff] }
 0x188   : > { %v422_v63 = vpop.f32.mrf.mxu0 }
 0x189   : > { %v455_v21 = vmin.f32 %v1080_v14, 0.0  ;;  %v1089_v27 = vadd.f32 %v422_v63, %v347_v18  ;;  %vm447_vm4 = vcmp.gt.f32.partialorder %v1080_v14, 0.0 }
 0x18b   : > { %v467_v31 = vmul.f32 1.442695, %v455_v21  ;;  %v452_v34 = vmin.f32 %v1089_v27, 0.0  ;;  %vm444_vm7 = vcmp.gt.f32.partialorder %v1089_v27, 0.0 }
 0x18d   : > { %v461_v37 = vmul.f32 1.442695, %v452_v34 }
 0x18e   : > { %v434_v6 = vpop.f32.mrf.mxu3 }
 0x18f   : > { %v435_v12 = vadd.f32 %v434_v6, %v365_v61  ;;  %v491_v61 = vld [vmem:[%s1166_s3] sm:$0xff]  ;;  %v505_v6 = vpop.permute.xlu1 %504 }
 0x190   : > { %v425_v7 = vpop.f32.mrf.mxu0 }
 0x191   : > { %v456_v16 = vmin.f32 %v435_v12, 0.0  ;;  %v1085_v22 = vadd.f32 %v425_v7, %v351_v9  ;;  %vm448_vm3 = vcmp.gt.f32.partialorder %v435_v12, 0.0  ;;  %v509_v7 = vpop.permute.xlu0 %508 }
 0x193   : > { %v469_v26 = vmul.f32 1.442695, %v456_v16  ;;  %v453_v32 = vmin.f32 %v1085_v22, 0.0  ;;  %vm445_vm6 = vcmp.gt.f32.partialorder %v1085_v22, 0.0 }
 0x195   : > { %v463_v0 = vmul.f32 1.442695, %v453_v32 }
 0x196   : > { %v437_v10 = vpop.f32.mrf.mxu3 }
 0x197   : > { %v438_v11 = vadd.f32 %v437_v10, %v370_v1  ;;  %v492_v1 = vld [vmem:[%s1166_s3 + $0x8] sm:$0xff]  ;;  %v501_v10 = vpop.permute.xlu1 %500 }
 0x198   : > { %v428_v13 = vpop.f32.mrf.mxu0 }
 0x199   : > { %v457_v15 = vmin.f32 %v438_v11, 0.0  ;;  %v1082_v17 = vadd.f32 %v428_v13, %v355_v8  ;;  %vm449_vm2 = vcmp.gt.f32.partialorder %v438_v11, 0.0 }
 0x19b   : > { %v471_v23 = vmul.f32 1.442695, %v457_v15  ;;  %v454_v28 = vmin.f32 %v1082_v17, 0.0  ;;  %vm446_vm5 = vcmp.gt.f32.partialorder %v1082_v17, 0.0 }
 0x19d   : > { %808 = vpow2.f32 %v471_v23  ;;  %v465_v35 = vmul.f32 1.442695, %v454_v28 }
 0x19e   : > { %v440_v19 = vpop.f32.mrf.mxu3  ;;  %810 = vpow2.f32 %v469_v26 }
 0x19f   : > { %v441_v24 = vadd.f32 %v440_v19, %v375_v59 }
 0x1a1   : > { %v458_v29 = vmin.f32 %v441_v24, 0.0  ;;  %vm450_vm1 = vcmp.gt.f32.partialorder %v441_v24, 0.0 }
 0x1a3   : > { %v473_v33 = vmul.f32 1.442695, %v458_v29  ;;  %v809_v36 = vpop.eup %808 }
 0x1a4   : > { %v811_v38 = vpop.eup %810  ;;  %v720_v42 = vadd.f32 -1.0, %v809_v36  ;;  %v578_v36 = vld [vmem:[%s1167_s4 + $0x8] sm:$0x1] }
 0x1a5   : > { %812 = vpow2.f32 %v473_v33  ;;  %v719_v45 = vadd.f32 -1.0, %v811_v38 }
 0x1a6   : > { %814 = vpow2.f32 %v467_v31  ;;  %v489_v47 = vsel %vm449_vm2, %v438_v11, %v720_v42  ;;  %v497_v11 = vpop.permute.xlu0 %496 }
 0x1a7   : > { %816 = vpow2.f32 %v465_v35  ;;  %v488_v50 = vsel %vm448_vm3, %v435_v12, %v719_v45 }
 0x1a8   : > { %818 = vpow2.f32 %v463_v0 }
 0x1a9   : > { %820 = vpow2.f32 %v461_v37 }
 0x1aa   : > { %822 = vpow2.f32 %v459_v40 }
 0x1ab   : > { %v813_v39 = vpop.eup %812 }
 0x1ac   : > { %v721_v41 = vadd.f32 -1.0, %v813_v39  ;;  %v815_v43 = vpop.eup %814 }
 0x1ad   : > { %v817_v46 = vpop.eup %816  ;;  %v718_v48 = vadd.f32 -1.0, %v815_v43 }
 0x1ae   : > { %v490_v44 = vsel %vm450_vm1, %v441_v24, %v721_v41  ;;  %v819_v49 = vpop.eup %818  ;;  %v717_v51 = vadd.f32 -1.0, %v817_v46 }
 0x1af   : > { %532 = vmatpush.msra.mxu1 %v490_v44  ;;  %740 = vmatpush.msra.mxu2 %v490_v44  ;;  %v821_v52 = vpop.eup %820  ;;  %v487_v53 = vsel %vm447_vm4, %v1080_v14, %v718_v48  ;;  %v716_v54 = vadd.f32 -1.0, %v819_v49 }
 0x1b0   : > { %v823_v55 = vpop.eup %822  ;;  %v486_v56 = vsel %vm446_vm5, %v1082_v17, %v717_v51  ;;  %v715_v57 = vadd.f32 -1.0, %v821_v52 }
 0x1b1   : > { %533 = vmatpush.msra.mxu1 %v489_v47  ;;  %741 = vmatpush.msra.mxu2 %v489_v47  ;;  %v485_v58 = vsel %vm445_vm6, %v1085_v22, %v716_v54  ;;  %v714_v59 = vadd.f32 -1.0, %v823_v55 }
 0x1b2   : > { %v484_v60 = vsel %vm444_vm7, %v1089_v27, %v715_v57 }
 0x1b3   : > { %534 = vmatpush.msra.mxu1 %v488_v50  ;;  %742 = vmatpush.msra.mxu2 %v488_v50  ;;  %v483_v63 = vsel %vm443_vm8, %v1092_v30, %v714_v59 }
 0x1b5   : > { %535 = vmatpush.msra.mxu1 %v487_v53  ;;  %743 = vmatpush.msra.mxu2 %v487_v53 }
 0x1b7   : > { %536 = vmatpush.msra.mxu1 %v486_v56  ;;  %744 = vmatpush.msra.mxu2 %v486_v56 }
 0x1b9   : > { %537 = vmatpush.msra.mxu1 %v485_v58  ;;  %745 = vmatpush.msra.mxu2 %v485_v58 }
 0x1bb   : > { %538 = vmatpush.msra.mxu1 %v484_v60  ;;  %746 = vmatpush.msra.mxu2 %v484_v60 }
 0x1bd   : > { %539 = vmatpush.msra.mxu1 %v483_v63  ;;  %747 = vmatpush.msra.mxu2 %v483_v63 }
 0x1be   : > { %722 = vmatmul.msk.f32.vlgmr.msra.gmra.mxu1 %vm511_vm9, %v491_v61  ;;  %725 = vmatmul.msk.f32.vlgmr.msra.gmra.mxu2 %vm511_vm9, %v494_v62 }
 0x1c6   : > { %723 = vmatmul.msk.f32.gmra.mxu1 %vm511_vm9, %v492_v1 }
 0x1ce   : > { %724 = vmatmul.msk.f32.gmra.mxu1 %vm511_vm9, %v493_v2 }
 0x1f5   : > { %v581_v37 = vpop.permute.xlu1 %580  ;;  %v585_v40 = vpop.permute.xlu0 %584 }
 0x23b   : > { %v541_v8 = vpop.f32.mrf.mxu1 }
 0x23c   : > { %v542_v16 = vadd.f32 %v541_v8, %v497_v11 }
 0x23e   : > { %v557_v19 = vmin.f32 %v542_v16, 0.0  ;;  %vm553_vm13 = vcmp.gt.f32.partialorder %v542_v16, 0.0 }
 0x240   : > { %v561_v24 = vmul.f32 1.442695, %v557_v19 }
 0x241   : > { %v550_v9 = vpop.f32.mrf.mxu2 }
 0x242   : > { %v551_v12 = vadd.f32 %v550_v9, %v509_v7 }
 0x243   : > { %v544_v13 = vpop.f32.mrf.mxu1 }
 0x244   : > { %v560_v14 = vmin.f32 %v551_v12, 0.0  ;;  %v545_v15 = vadd.f32 %v544_v13, %v501_v10  ;;  %vm556_vm10 = vcmp.gt.f32.partialorder %v551_v12, 0.0 }
 0x246   : > { %v567_v17 = vmul.f32 1.442695, %v560_v14  ;;  %v558_v18 = vmin.f32 %v545_v15, 0.0  ;;  %vm554_vm12 = vcmp.gt.f32.partialorder %v545_v15, 0.0 }
 0x248   : > { %824 = vpow2.f32 %v567_v17  ;;  %v563_v22 = vmul.f32 1.442695, %v558_v18 }
 0x24a   : > { %826 = vpow2.f32 %v563_v22 }
 0x24b   : > { %v547_v21 = vpop.f32.mrf.mxu1  ;;  %828 = vpow2.f32 %v561_v24 }
 0x24c   : > { %v548_v23 = vadd.f32 %v547_v21, %v505_v6 }
 0x24e   : > { %v825_v25 = vpop.eup %824  ;;  %v559_v26 = vmin.f32 %v548_v23, 0.0  ;;  %vm555_vm11 = vcmp.gt.f32.partialorder %v548_v23, 0.0 }
 0x24f   : > { %v729_v27 = vadd.f32 -1.0, %v825_v25 }
 0x250   : > { %v565_v28 = vmul.f32 1.442695, %v559_v26  ;;  %v827_v30 = vpop.eup %826 }
 0x251   : > { %v576_v29 = vsel %vm556_vm10, %v551_v12, %v729_v27  ;;  %v829_v31 = vpop.eup %828  ;;  %v727_v3 = vadd.f32 -1.0, %v827_v30 }
 0x252   : > { %830 = vpow2.f32 %v565_v28  ;;  %605 = vmatpush.msrb.mxu2 %v576_v29  ;;  %v726_v34 = vadd.f32 -1.0, %v829_v31 }
 0x253   : > { %v574_v35 = vsel %vm554_vm12, %v545_v15, %v727_v3 }
 0x254   : > { %v573_v0 = vsel %vm553_vm13, %v542_v16, %v726_v34 }
 0x258   : > { %v831_v32 = vpop.eup %830 }
 0x259   : > { %v728_v33 = vadd.f32 -1.0, %v831_v32 }
 0x25b   : > { %v575_v5 = vsel %vm555_vm11, %v548_v23, %v728_v33 }
 0x25c   : > { %606 = vmatpush.msrb.mxu2 %v575_v5 }
 0x25e   : > { %607 = vmatpush.msrb.mxu2 %v574_v35 }
 0x260   : > { %608 = vmatpush.msrb.mxu2 %v573_v0 }
 0x261   : > { %730 = vmatmul.msk.f32.vlgmr.msrb.gmra.mxu2 %vm377_vm0, %v577_v4 }
 0x269   : > { %731 = vmatmul.msk.f32.gmra.mxu2 %vm377_vm0, %v578_v36 }
 0x2e4   : > { %v610_v38 = vpop.f32.mrf.mxu2 }
 0x2e5   : > { %v611_v39 = vadd.f32 %v610_v38, %v581_v37 }
 0x2e7   : > { %616 = vst [vmem:[%s218_s12] sm:$0xff] %v611_v39 }
 0x2ec   : > { %v613_v41 = vpop.f32.mrf.mxu2 }
 0x2ed   : > { %v614_v42 = vadd.f32 %v613_v41, %v585_v40 }
 0x2ef   : > { %617 = vst [vmem:[%s218_s12 + $0x8] sm:$0x1] %v614_v42 }
 0x2f0   : > { %859 = shalt.err (!%p856_p3)
}
 0x2f1   : > { %s901_s6 = smov 128   ;;  %s902_s7 = smov 256  }
 0x2f2   : > { %s903_s8 = smov 8  }
 0x2f3   : > { %748 = dma.vmem_to_hbm [thread:$0]  (%p972_p5), %s631_s13, 256, %s633_s14, %s619_s15, %s901_s6, %s902_s7, %s903_s8  }
 0x2f4 PF: > { %p754_p4 = scmp.ge.s32.totalorder %s894_s21, 2  ;;  %s647_s9 = sand.u32 1, %s882_s18  }
 0x2f5   : > { %s648_s10 = scalar_lea.sflag [#allocation3], %s647_s9 }
 0x2f6   : > { %p751_p7 = pnand %p754_p4, %p976_p6 }
 0x2f8   : > { %p752_p8 = pneg %p751_p7 }
 0x2fa   : > { %877 = dma.done.wait (%p752_p8), %s648_s10, 256  }
 0x2fb   : > { %879 = vsyncadd (%p752_p8), %s648_s10, 4294967040  ;;  %p15_p9 = scmp.ge.s32.totalorder %s959_s24, 4   ;;  %s1171_s18 = smov %s886_s19 }
 0x2fc   : > { %s1172_s19 = smov %s890_s20  ;;  %s1173_s20 = smov %s970_s27 }
 0x2fd   : > { %s1174_s21 = smov %s959_s24  ;;  %17 = sbr.rel (!%p15_p9) target bundleno = 3 (0x3), region = 75 }
 0x302   :  { %654 = vsyncpa [#allocation3], 1 }
 0x303   :  { %656 = vsyncpa [#allocation3 + $0x1], 1 }

</bundles_post_ra>
